<compile_context>
chip_gen: v5e
topology: v5e:2x2
jax: 0.10.0
libtpu: 0.0.40
codegen_flags: <defaults>
</compile_context>

<pallas_src>
import jax
import jax.numpy as jnp
from jax import lax
from jax.experimental import pallas as pl
from jax.experimental.pallas import tpu as pltpu

LANE = 128
SUBLANE = 8
ALIGN = SUBLANE * LANE          # kernel handles a (8*128)-aligned prefix
MAX_TILE_ROWS = 4096            # 4096x128 f32 = 2 MiB per operand per grid step
VMEM_LIMIT_BYTES = 32 * 1024 * 1024


def _num_tensorcores() -> int:
    """Best-effort TensorCore-per-chip count; falls back to 1 (always safe)."""
    try:
        info = pltpu.get_tpu_info()
        for name in ("num_cores", "core_count", "tensorcores_per_chip",
                     "num_tensorcores", "num_tensor_cores"):
            v = getattr(info, name, None)
            if isinstance(v, int) and v >= 1:
                return v
    except Exception:
        pass
    try:
        v = getattr(jax.devices()[0], "num_cores", None)
        if isinstance(v, int) and v >= 1:
            return v
    except Exception:
        pass
    return 1


def _make_kernel(tile_rows, rows, bpc, needs_mask):
    groups = tile_rows // SUBLANE

    def kernel(p_ref, r_ref, o_ref, acc_ref):
        c = pl.program_id(0)
        i = pl.program_id(1)

        @pl.when(i == 0)
        def _init():
            acc_ref[...] = jnp.zeros_like(acc_ref)

        # Cast in-kernel (hidden under DMA); multiply is pure elementwise VPU.
        prod = p_ref[...].astype(jnp.float32) * r_ref[...].astype(jnp.float32)

        def _accumulate(x):
            # (tile_rows,128) -> (groups,8,128) keeps the (8,128) tile layout,
            # so the axis-0 sum is a tree of per-lane vreg adds (no XLU) and
            # the accumulator stays a single fixed (8,128) VMEM tile.
            acc_ref[...] += jnp.sum(x.reshape(groups, SUBLANE, LANE), axis=0)

        if needs_mask:
            blk = c * bpc + i                      # logical (unclamped) block
            is_ragged = (blk + 1) * tile_rows > rows

            @pl.when(jnp.logical_not(is_ragged))
            def _fast():                           # interior blocks: no mask
                _accumulate(prod)

            @pl.when(is_ragged)
            def _masked():                         # last / duplicated block
                row0 = blk * tile_rows
                ridx = row0 + lax.broadcasted_iota(
                    jnp.int32, (tile_rows, LANE), 0)
                _accumulate(jnp.where(ridx < rows, prod, 0.0))
        else:
            _accumulate(prod)

        @pl.when(i == pl.num_programs(1) - 1)
        def _finalize():
            s = jnp.sum(acc_ref[...])              # single cross-lane reduce
            # Negation folded here; one lane-dense vreg written per core.
            o_ref[...] = jnp.broadcast_to(-s, (1, SUBLANE, LANE))

    return kernel


def gan_loss(prob: jax.Array, reward: jax.Array) -> jax.Array:
    """Computes -sum(prob * reward) with a Pallas TPU reduction kernel."""
    assert prob.shape == reward.shape, "prob/reward must have matching shapes"
    out_dtype = jnp.result_type(prob.dtype, reward.dtype)

    p = prob.reshape(-1)
    r = reward.reshape(-1)
    total = p.shape[0]

    # Split at a full-vreg (8*128) boundary instead of padding: the aligned
    # prefix streams through the kernel; the tiny (<1024 elem) tail is summed
    # in plain JAX.  In the common aligned case this is a free reshape.
    main = (total // ALIGN) * ALIGN
    tail_sum = jnp.zeros((), jnp.float32)
    if main != total:
        tail_sum = jnp.sum(p[main:].astype(jnp.float32) *
                           r[main:].astype(jnp.float32))
        # TODO(synk): prefix slice below may still materialize a copy in XLA;
        # only hit when the flat size is not a multiple of 1024.
        p = p[:main]
        r = r[:main]

    if main == 0:
        return (-tail_sum).astype(out_dtype)

    rows = main // LANE                    # multiple of 8 by construction
    p2 = p.reshape(rows, LANE)             # contiguous -> free reshape
    r2 = r.reshape(rows, LANE)

    tile_rows = min(MAX_TILE_ROWS, rows)   # multiple of 8, never exceeds rows
    nblocks = pl.cdiv(rows, tile_rows)

    # Megacore split only when it can pay off: >=2 TCs and enough blocks that
    # a possible duplicated (clamped) block is a small fraction of the work.
    nc_hw = min(_num_tensorcores(), 2)
    nc = 2 if (nc_hw >= 2 and nblocks >= 8) else 1
    bpc = pl.cdiv(nblocks, nc)             # row-blocks handled per core
    clamp = nc * bpc != nblocks
    needs_mask = (rows % tile_rows != 0) or clamp

    def in_map(c, i):
        blk = c * bpc + i
        if clamp:
            # Keep the DMA in bounds; the duplicated block's logical rows are
            # all >= `rows`, so the masked branch zeroes its contribution.
            blk = jnp.minimum(blk, nblocks - 1)
        return (blk, 0)

    kernel = _make_kernel(tile_rows, rows, bpc, needs_mask)

    partials = pl.pallas_call(
        kernel,
        out_shape=jax.ShapeDtypeStruct((nc, SUBLANE, LANE), jnp.float32),
        grid_spec=pltpu.PrefetchScalarGridSpec(
            num_scalar_prefetch=0,
            grid=(nc, bpc),
            in_specs=[
                pl.BlockSpec((tile_rows, LANE), in_map),
                pl.BlockSpec((tile_rows, LANE), in_map),
            ],
            out_specs=pl.BlockSpec((1, SUBLANE, LANE), lambda c, i: (c, 0, 0)),
            scratch_shapes=[pltpu.VMEM((SUBLANE, LANE), jnp.float32)],
        ),
        compiler_params=pltpu.CompilerParams(
            # parallel: shard row-blocks across TensorCores where available;
            # arbitrary: sequential reduction axis with resident accumulator.
            dimension_semantics=("parallel", "arbitrary"),
            vmem_limit_bytes=VMEM_LIMIT_BYTES,
        ),
    )(p2, r2)

    # Tiny epilogue: per-core partials already carry the negation.
    loss = jnp.sum(partials[:, 0, 0]) - tail_sum
    return loss.astype(out_dtype)


if __name__ == "__main__":
    key = jax.random.PRNGKey(0)
    kp, kr = jax.random.split(key)

    # Small NCHW-shaped inputs, consistent with an adversarial-training use:
    # prob = per-token/pixel probabilities (or log-probs), reward = rewards.
    prob = jax.random.uniform(kp, (2, 4, 16, 16), dtype=jnp.float32)
    reward = jax.random.normal(kr, (2, 4, 16, 16), dtype=jnp.float32)

    loss_fn = jax.jit(gan_loss)
    loss = jax.block_until_ready(loss_fn(prob, reward))

    # Reference check in plain JAX (mirrors the PyTorch forward exactly).
    ref = -jnp.sum(prob * reward)
    assert jnp.allclose(loss, ref, rtol=1e-5, atol=1e-5), (loss, ref)

    print("KERNEL_OK")
</pallas_src>

<mosaic_0001>
module attributes {stable_mosaic.version = 11 : i64} {
  func.func @kernel(%arg0: i32, %arg1: i32, %arg2: memref<16x128xf32, #tpu.memory_space<vmem>>, %arg3: memref<16x128xf32, #tpu.memory_space<vmem>>, %arg4: memref<1x8x128xf32, #tpu.memory_space<vmem>>, %arg5: memref<8x128xf32, #tpu.memory_space<vmem>>) attributes {dimension_semantics = [#tpu.dimension_semantics<parallel>, #tpu.dimension_semantics<arbitrary>], iteration_bounds = array<i64: 1, 1>, scalar_prefetch = 0 : i64, scratch_operands = 1 : i64, tpu.core_type = #tpu.core_type<tc>, window_params = [{transform_indices = @transform_0, window_bounds = array<i64: 16, 128>}, {transform_indices = @transform_1, window_bounds = array<i64: 16, 128>}, {transform_indices = @transform_2, window_bounds = array<i64: 1, 8, 128>}]} {
    %c0_i32 = arith.constant 0 : i32
    %0 = arith.cmpi eq, %arg1, %c0_i32 : i32
    %1 = arith.extui %0 : i1 to i32
    %c0_i32_0 = arith.constant 0 : i32
    %2 = arith.cmpi ne, %1, %c0_i32_0 : i32
    scf.if %2 {
      %cst_10 = arith.constant 0.000000e+00 : f32
      %14 = vector.broadcast %cst_10 : f32 to vector<8x128xf32>
      %c0_11 = arith.constant 0 : index
      %c0_12 = arith.constant 0 : index
      %15 = vector.load %arg5[%c0_11, %c0_12] : memref<8x128xf32, #tpu.memory_space<vmem>>, vector<8x128xf32>
      tpu.vector_store %arg5[%c0_11, %c0_12], %14 {strides = array<i32>} : memref<8x128xf32, #tpu.memory_space<vmem>>, vector<8x128xf32>,
    } else {
    }
    %c0 = arith.constant 0 : index
    %c0_1 = arith.constant 0 : index
    %3 = vector.load %arg2[%c0, %c0_1] : memref<16x128xf32, #tpu.memory_space<vmem>>, vector<16x128xf32>
    %c0_2 = arith.constant 0 : index
    %c0_3 = arith.constant 0 : index
    %4 = vector.load %arg3[%c0_2, %c0_3] : memref<16x128xf32, #tpu.memory_space<vmem>>, vector<16x128xf32>
    %5 = arith.mulf %3, %4 : vector<16x128xf32>
    %c0_4 = arith.constant 0 : index
    %c0_5 = arith.constant 0 : index
    %6 = vector.load %arg5[%c0_4, %c0_5] : memref<8x128xf32, #tpu.memory_space<vmem>>, vector<8x128xf32>
    %7 = vector.shape_cast %5 : vector<16x128xf32> to vector<2x8x128xf32>
    %cst = arith.constant dense<0.000000e+00> : vector<8x128xf32>
    %8 = vector.multi_reduction <add>, %7, %cst [0] : vector<2x8x128xf32> to vector<8x128xf32>
    %9 = arith.addf %6, %8 : vector<8x128xf32>
    %c0_6 = arith.constant 0 : index
    %c0_7 = arith.constant 0 : index
    %10 = vector.load %arg5[%c0_6, %c0_7] : memref<8x128xf32, #tpu.memory_space<vmem>>, vector<8x128xf32>
    tpu.vector_store %arg5[%c0_6, %c0_7], %9 {strides = array<i32>} : memref<8x128xf32, #tpu.memory_space<vmem>>, vector<8x128xf32>,
    %c0_i32_8 = arith.constant 0 : i32
    %11 = arith.cmpi eq, %arg1, %c0_i32_8 : i32
    %12 = arith.extui %11 : i1 to i32
    %c0_i32_9 = arith.constant 0 : i32
    %13 = arith.cmpi ne, %12, %c0_i32_9 : i32
    scf.if %13 {
      %c0_10 = arith.constant 0 : index
      %c0_11 = arith.constant 0 : index
      %14 = vector.load %arg5[%c0_10, %c0_11] : memref<8x128xf32, #tpu.memory_space<vmem>>, vector<8x128xf32>
      %15 = vector.shape_cast %14 : vector<8x128xf32> to vector<1x8x128xf32>
      %cst_12 = arith.constant dense<0.000000e+00> : vector<1xf32>
      %16 = vector.multi_reduction <add>, %15, %cst_12 [1, 2] : vector<1x8x128xf32> to vector<1xf32>
      %17 = vector.shape_cast %16 : vector<1xf32> to vector<1x1x1xf32>
      %18 = vector.extract %17[0, 0, 0] : f32 from vector<1x1x1xf32>
      %cst_13 = arith.constant 0.000000e+00 : f32
      %19 = arith.subf %cst_13, %18 : f32
      %20 = vector.broadcast %19 : f32 to vector<1x8x128xf32>
      %c0_14 = arith.constant 0 : index
      %c0_15 = arith.constant 0 : index
      %c0_16 = arith.constant 0 : index
      %21 = vector.load %arg4[%c0_14, %c0_15, %c0_16] : memref<1x8x128xf32, #tpu.memory_space<vmem>>, vector<1x8x128xf32>
      tpu.vector_store %arg4[%c0_14, %c0_15, %c0_16], %20 {strides = array<i32>} : memref<1x8x128xf32, #tpu.memory_space<vmem>>, vector<1x8x128xf32>,
    } else {
    }
    return
  }
  func.func @transform_0(%arg0: i32, %arg1: i32) -> (i32, i32) {
    %c1_i32 = arith.constant 1 : i32
    %0 = arith.muli %arg0, %c1_i32 : i32
    %1 = arith.addi %0, %arg1 : i32
    %c0_i32 = arith.constant 0 : i32
    %c0_i32_0 = arith.constant 0 : i32
    return %1, %c0_i32 : i32, i32
  }
  func.func @transform_1(%arg0: i32, %arg1: i32) -> (i32, i32) {
    %c1_i32 = arith.constant 1 : i32
    %0 = arith.muli %arg0, %c1_i32 : i32
    %1 = arith.addi %0, %arg1 : i32
    %c0_i32 = arith.constant 0 : i32
    %c0_i32_0 = arith.constant 0 : i32
    return %1, %c0_i32 : i32, i32
  }
  func.func @transform_2(%arg0: i32, %arg1: i32) -> (i32, i32, i32) {
    %c0_i32 = arith.constant 0 : i32
    %c0_i32_0 = arith.constant 0 : i32
    %c0_i32_1 = arith.constant 0 : i32
    return %arg0, %c0_i32, %c0_i32_0 : i32, i32, i32
  }
}

</mosaic_0001>

<bundles_post_ra>
// kernel: gan_loss.1
= control target key start
LH: loop header
LB: loop body
LE: loop exit
PB: predicated region body
PF: predicated region fallthrough
CT: control target
= control target key end

     0   :  { %s134_s0 = inlined_call_operand.vmem [shape: f32[16,128], index: 0, kind: input, shape index: {}]   ;;  %s135_s1 = inlined_call_operand.vmem [shape: f32[16,128], index: 1, kind: input, shape index: {}]   ;;  %s136_s2 = inlined_call_operand.vmem [shape: f32[1,8,128], index: 2, kind: output, shape index: {}]  }
   0x1   :  { %v60_v0 = vld [vmem:[%s134_s0] sm:$0xff]  ;;  %v61_v1 = vld [vmem:[%s134_s0 + $0x8] sm:$0xff] }
   0x2   :  { %v62_v2 = vld [vmem:[%s135_s1] sm:$0xff]  ;;  %v63_v3 = vld [vmem:[%s135_s1 + $0x8] sm:$0xff] }
   0x3   :  { %v64_v4 = vmul.f32 %v62_v2, %v60_v0  ;;  %v65_v5 = vmul.f32 %v63_v3, %v61_v1 }
   0x5   :  { %v67_v6 = vadd.f32 %v65_v5, %v64_v4 }
   0x7   :  { %74 = vadd.xlane.f32.xlu0 %v67_v6 }
  0x7a   :  { %v75_v7 = vpop.xlane.xlu0 %74 }
  0x7b   :  { %v76_v8 = vrot.slane %v75_v7, 4 }
  0x7d   :  { %v77_v9 = vadd.f32 %v76_v8, %v75_v7 }
  0x7f   :  { %v78_v10 = vrot.slane %v77_v9, 2 }
  0x81   :  { %v79_v11 = vadd.f32 %v78_v10, %v77_v9 }
  0x83   :  { %v80_v12 = vrot.slane %v79_v11, 1 }
  0x85   :  { %v81_v13 = vadd.f32 %v80_v12, %v79_v11 }
  0x87   :  { %102 = vpush %v81_v13 }
  0xb8   :  { %s103_s0 = spop %102 }
  0xb9   :  { %s83_s17 = ssub.f32 0.0, %s103_s0 }
  0xbb   :  { %v84_v14 = vstv %s83_s17 }
  0xbc   :  { %85 = vst [vmem:[%s136_s2] sm:$0xff] %v84_v14 }

</bundles_post_ra>
